<compile_context>
chip_gen: v6e
topology: v6e:2x2x1
jax: 0.10.0
libtpu: 0.0.40
codegen_flags: <defaults>
</compile_context>

<pallas_src>
import functools

import jax
import jax.numpy as jnp
from jax.experimental import pallas as pl
from jax.experimental.pallas import tpu as pltpu

EPS = 1e-5


def _round_up(a, m):
    return ((a + m - 1) // m) * m


def _round_down(a, m):
    return (a // m) * m


def _vmem_budget_bytes():
    """~75% of this chip's physical VMEM; conservative 48 MiB fallback."""
    try:
        cap = int(pltpu.get_tpu_info().vmem_capacity_bytes)
    except Exception:
        cap = 64 * 2**20  # v7x-sized fallback: safe on every generation
    return int(cap * 0.75)


def prenorm_linear_kernel(x_ref, w_ref, b_ref, o_ref, y_ref, *, d_true):
    """One (row-tile, col-tile) grid step of Linear(LayerNorm(x)).

    x_ref : (TM, D)  input rows (model dtype)
    w_ref : (D,  TN) bf16 folded weight (gamma pre-multiplied into rows)
    b_ref : (1,  TN) f32 folded bias    (beta @ W + b)
    o_ref : (TM, TN) output tile (model dtype)
    y_ref : (TM, D)  bf16 VMEM scratch with the normalized rows; computed once per
                     row tile (column step 0) and reused for every column tile.
    """
    @pl.when(pl.program_id(1) == 0)
    def _():
        x = x_ref[...].astype(jnp.float32)
        # One-pass LayerNorm statistics (E[x], E[x^2]) in f32, biased variance.
        inv_d = 1.0 / d_true
        s = jnp.sum(x, axis=-1, keepdims=True)
        sq = jnp.sum(x * x, axis=-1, keepdims=True)
        mean = s * inv_d
        var = jnp.maximum(sq * inv_d - mean * mean, 0.0)
        inv_std = jax.lax.rsqrt(var + EPS)  # EUP slot
        # gamma/beta are folded into w/b in the wrapper -> no affine VALU work here.
        y_ref[...] = ((x - mean) * inv_std).astype(jnp.bfloat16)

    # fn(.) == Linear(dim, dim): bf16 operands, f32 accumulation on the MXU.
    out = jnp.dot(y_ref[...], w_ref[...], preferred_element_type=jnp.float32)
    o_ref[...] = (out + b_ref[...]).astype(o_ref.dtype)


def prenorm_fn(x, gamma, beta, w, b, *, tile_rows=None):
    """PreNorm with fn = Linear(dim, dim): returns Linear(LayerNorm(x)) for x:[B,N,D]."""
    # TODO(synk): `fn` is an arbitrary wrapped module in PredFormer (Attention /
    # FeedForward); it is instantiated here as Linear(dim, dim). Other fn's need
    # their own fused kernels.
    B, N, D = x.shape
    M = B * N
    x2 = x.reshape(M, D)
    x_bytes = x.dtype.itemsize

    # ---- Fold the LayerNorm affine into the Linear (wrapper-side, f32) ----
    # (n * gamma + beta) @ W + b  ==  n @ (gamma[:, None] * W) + (beta @ W + b)
    gamma_f = gamma.astype(jnp.float32)
    beta_f = beta.astype(jnp.float32)
    w_f = w.astype(jnp.float32)
    w_folded = (gamma_f[:, None] * w_f).astype(jnp.bfloat16)  # cast once, MXU dtype
    b_folded = (beta_f @ w_f + b.astype(jnp.float32)).reshape(1, D)

    # ---- Tile sizing from the per-generation VMEM budget ----
    budget = _vmem_budget_bytes()

    # Large-D path: column-tile the weight when its resident bf16 copy would eat a
    # big slice of VMEM (needs D % 128 == 0 for lane-aligned column blocks).
    w_full_bytes = D * D * 2
    if D % 128 == 0 and 2 * w_full_bytes > budget // 2:
        tile_n = max(128, _round_down((budget // 8) // (D * 2), 128))
        tile_n = min(tile_n, D)
    else:
        tile_n = D
    n_col = pl.cdiv(D, tile_n)
    single_buffer_invariants = n_col == 1  # weight/bias are grid-invariant
    w_resident_bytes = D * tile_n * 2 * (1 if single_buffer_invariants else 2)

    # Per-row VMEM: double-buffered x tile + double-buffered out tile + bf16 y scratch.
    per_row_bytes = 2 * D * x_bytes + 2 * tile_n * x_bytes + D * 2
    avail = max(budget - w_resident_bytes - (1 << 20), 8 * per_row_bytes)
    if tile_rows is None:
        tile_rows = min(avail // per_row_bytes, 2048)
    tile_rows = int(min(max(int(tile_rows), 8), _round_up(M, 8)))
    # MXU-friendly alignment: multiple of 128 when possible, else multiple of 8.
    tile_rows = _round_down(tile_rows, 128) if tile_rows >= 128 else _round_up(tile_rows, 8)
    n_row = pl.cdiv(M, tile_rows)

    vmem_est = w_resident_bytes + tile_rows * per_row_bytes + 4 * tile_n * 4
    vmem_limit = int(min(budget, max(int(1.5 * vmem_est), 16 * 2**20)))

    kernel = functools.partial(prenorm_linear_kernel, d_true=float(D))
    out_shape = jax.ShapeDtypeStruct((M, D), x.dtype)

    def _build(single_buffer):
        def inv_spec(shape, index_map):
            # Grid-invariant operands never use a second pipeline buffer; dropping it
            # frees D*tile_n*2 bytes of VMEM -> larger feasible row tiles.
            if single_buffer:
                return pl.BlockSpec(shape, index_map, pipeline_mode=pl.Buffered(1))
            return pl.BlockSpec(shape, index_map)

        return pl.pallas_call(
            kernel,
            out_shape=out_shape,
            grid_spec=pltpu.PrefetchScalarGridSpec(
                num_scalar_prefetch=0,
                grid=(n_row, n_col),
                in_specs=[
                    pl.BlockSpec((tile_rows, D), lambda i, j: (i, 0)),  # x rows
                    inv_spec((D, tile_n), lambda i, j: (0, j)),         # folded weight (bf16)
                    inv_spec((1, tile_n), lambda i, j: (0, j)),         # folded bias (f32)
                ],
                out_specs=pl.BlockSpec((tile_rows, tile_n), lambda i, j: (i, j)),
                scratch_shapes=[pltpu.VMEM((tile_rows, D), jnp.bfloat16)],
            ),
            compiler_params=pltpu.CompilerParams(
                # Row axis shards across v7x's 2 TensorCores; the column axis carries
                # the normalized-y scratch so it must stay sequential.
                dimension_semantics=("parallel", "arbitrary"),
                vmem_limit_bytes=vmem_limit,
            ),
        )

    if single_buffer_invariants:
        try:
            out2 = _build(True)(x2, w_folded, b_folded)
        except Exception:
            # Fallback if this jax build rejects pipeline_mode / Buffered(1):
            # identical math with default double-buffering.
            out2 = _build(False)(x2, w_folded, b_folded)
    else:
        out2 = _build(False)(x2, w_folded, b_folded)

    return out2.reshape(B, N, D)


if __name__ == "__main__":
    # Small transformer-token-stream shapes: batch=2, seq=8, dim=32.
    B, N, D = 2, 8, 32
    key = jax.random.PRNGKey(0)
    kx, kg, kb, kw, kbias = jax.random.split(key, 5)

    x = jax.random.normal(kx, (B, N, D), dtype=jnp.float32)

    # LayerNorm affine params (perturbed from the PyTorch defaults so the affine
    # path — folded into the Linear here — is actually exercised).
    gamma = 1.0 + 0.1 * jax.random.normal(kg, (D,), dtype=jnp.float32)
    beta = 0.1 * jax.random.normal(kb, (D,), dtype=jnp.float32)

    # fn == Linear(D, D) parameters, deterministic.
    w = jax.random.normal(kw, (D, D), dtype=jnp.float32) / jnp.sqrt(D)
    bias = 0.1 * jax.random.normal(kbias, (D,), dtype=jnp.float32)

    out = prenorm_fn(x, gamma, beta, w, bias)
    out = jax.block_until_ready(out)

    # Pure-JAX references (LayerNorm + Linear), biased variance like PyTorch.
    mean = jnp.mean(x, axis=-1, keepdims=True)
    var = jnp.mean((x - mean) ** 2, axis=-1, keepdims=True)
    n_ref = (x - mean) / jnp.sqrt(var + EPS)
    y_ref = n_ref * gamma + beta

    # (a) fold-matched bf16-operand / f32-accumulate reference (mirrors the kernel).
    w_folded_ref = (gamma[:, None] * w).astype(jnp.bfloat16)
    b_folded_ref = beta @ w + bias
    ref_bf16 = jnp.einsum(
        "bnd,de->bne", n_ref.astype(jnp.bfloat16), w_folded_ref,
        preferred_element_type=jnp.float32) + b_folded_ref
    # (b) full-f32 reference (PyTorch semantics); loose tol accounts for bf16 matmul.
    ref_f32 = jnp.einsum("bnd,de->bne", y_ref, w) + bias

    assert jnp.allclose(out, ref_bf16, atol=2e-2, rtol=2e-2), "mismatch vs bf16 reference"
    assert jnp.allclose(out, ref_f32, atol=3e-2, rtol=3e-2), "mismatch vs f32 reference"

    print("KERNEL_OK")
</pallas_src>

<mosaic_0001>
module attributes {stable_mosaic.version = 11 : i64} {
  func.func @prenorm_linear_kernel(%arg0: i32, %arg1: i32, %arg2: memref<16x32xf32, #tpu.memory_space<vmem>>, %arg3: memref<32x32xbf16, #tpu.memory_space<vmem>>, %arg4: memref<1x32xf32, #tpu.memory_space<vmem>>, %arg5: memref<16x32xf32, #tpu.memory_space<vmem>>, %arg6: memref<16x32xbf16, #tpu.memory_space<vmem>>) attributes {dimension_semantics = [#tpu.dimension_semantics<parallel>, #tpu.dimension_semantics<arbitrary>], iteration_bounds = array<i64: 1, 1>, scalar_prefetch = 0 : i64, scratch_operands = 1 : i64, tpu.core_type = #tpu.core_type<tc>, window_params = [{transform_indices = @transform_0, window_bounds = array<i64: 16, 32>}, {pipeline_mode = #tpu.pipeline_mode<synchronous>, transform_indices = @transform_1, window_bounds = array<i64: 32, 32>}, {pipeline_mode = #tpu.pipeline_mode<synchronous>, transform_indices = @transform_2, window_bounds = array<i64: 1, 32>}, {transform_indices = @transform_3, window_bounds = array<i64: 16, 32>}]} {
    %c0_i32 = arith.constant 0 : i32
    %0 = arith.cmpi eq, %arg1, %c0_i32 : i32
    %1 = arith.extui %0 : i1 to i32
    %c0_i32_0 = arith.constant 0 : i32
    %2 = arith.cmpi ne, %1, %c0_i32_0 : i32
    scf.if %2 {
      %c0_8 = arith.constant 0 : index
      %c0_9 = arith.constant 0 : index
      %10 = vector.load %arg2[%c0_8, %c0_9] : memref<16x32xf32, #tpu.memory_space<vmem>>, vector<16x32xf32>
      %cst_10 = arith.constant dense<0.000000e+00> : vector<16xf32>
      %11 = vector.multi_reduction <add>, %10, %cst_10 [1] : vector<16x32xf32> to vector<16xf32>
      %12 = vector.shape_cast %11 : vector<16xf32> to vector<16x1xf32>
      %13 = arith.mulf %10, %10 : vector<16x32xf32>
      %cst_11 = arith.constant dense<0.000000e+00> : vector<16xf32>
      %14 = vector.multi_reduction <add>, %13, %cst_11 [1] : vector<16x32xf32> to vector<16xf32>
      %15 = vector.shape_cast %14 : vector<16xf32> to vector<16x1xf32>
      %cst_12 = arith.constant 3.125000e-02 : f32
      %16 = vector.broadcast %cst_12 : f32 to vector<16x1xf32>
      %17 = arith.mulf %12, %16 : vector<16x1xf32>
      %cst_13 = arith.constant 3.125000e-02 : f32
      %18 = vector.broadcast %cst_13 : f32 to vector<16x1xf32>
      %19 = arith.mulf %15, %18 : vector<16x1xf32>
      %20 = arith.mulf %17, %17 : vector<16x1xf32>
      %21 = arith.subf %19, %20 : vector<16x1xf32>
      %cst_14 = arith.constant 0.000000e+00 : f32
      %22 = vector.broadcast %cst_14 : f32 to vector<16x1xf32>
      %23 = arith.maximumf %21, %22 : vector<16x1xf32>
      %cst_15 = arith.constant 9.99999974E-6 : f32
      %24 = vector.broadcast %cst_15 : f32 to vector<16x1xf32>
      %25 = arith.addf %23, %24 : vector<16x1xf32>
      %26 = math.rsqrt %25 : vector<16x1xf32>
      %27 = vector.broadcast %17 : vector<16x1xf32> to vector<16x32xf32>
      %28 = arith.subf %10, %27 : vector<16x32xf32>
      %29 = vector.broadcast %26 : vector<16x1xf32> to vector<16x32xf32>
      %30 = arith.mulf %28, %29 : vector<16x32xf32>
      %31 = arith.truncf %30 : vector<16x32xf32> to vector<16x32xbf16>
      %c0_16 = arith.constant 0 : index
      %c0_17 = arith.constant 0 : index
      %32 = vector.load %arg6[%c0_16, %c0_17] : memref<16x32xbf16, #tpu.memory_space<vmem>>, vector<16x32xbf16>
      tpu.vector_store %arg6[%c0_16, %c0_17], %31 {strides = array<i32>} : memref<16x32xbf16, #tpu.memory_space<vmem>>, vector<16x32xbf16>,
    } else {
    }
    %c0 = arith.constant 0 : index
    %c0_1 = arith.constant 0 : index
    %3 = vector.load %arg6[%c0, %c0_1] : memref<16x32xbf16, #tpu.memory_space<vmem>>, vector<16x32xbf16>
    %c0_2 = arith.constant 0 : index
    %c0_3 = arith.constant 0 : index
    %4 = vector.load %arg3[%c0_2, %c0_3] : memref<32x32xbf16, #tpu.memory_space<vmem>>, vector<32x32xbf16>
    %cst = arith.constant dense<0.000000e+00> : vector<16x32xf32>
    %5 = tpu.matmul %3, %4, %cst {dimension_numbers = #tpu.dot_dimension_numbers<[1], [0], [0], [1], [0, 0, 1, 1], [], []>} : vector<16x32xbf16>, vector<32x32xbf16>, vector<16x32xf32> -> vector<16x32xf32>
    %c0_4 = arith.constant 0 : index
    %c0_5 = arith.constant 0 : index
    %6 = vector.load %arg4[%c0_4, %c0_5] : memref<1x32xf32, #tpu.memory_space<vmem>>, vector<1x32xf32>
    %7 = vector.broadcast %6 : vector<1x32xf32> to vector<16x32xf32>
    %8 = arith.addf %5, %7 : vector<16x32xf32>
    %c0_6 = arith.constant 0 : index
    %c0_7 = arith.constant 0 : index
    %9 = vector.load %arg5[%c0_6, %c0_7] : memref<16x32xf32, #tpu.memory_space<vmem>>, vector<16x32xf32>
    tpu.vector_store %arg5[%c0_6, %c0_7], %8 {strides = array<i32>} : memref<16x32xf32, #tpu.memory_space<vmem>>, vector<16x32xf32>,
    return
  }
  func.func @transform_0(%arg0: i32, %arg1: i32) -> (i32, i32) {
    %c0_i32 = arith.constant 0 : i32
    %c0_i32_0 = arith.constant 0 : i32
    return %arg0, %c0_i32 : i32, i32
  }
  func.func @transform_1(%arg0: i32, %arg1: i32) -> (i32, i32) {
    %c0_i32 = arith.constant 0 : i32
    %c0_i32_0 = arith.constant 0 : i32
    return %c0_i32, %arg1 : i32, i32
  }
  func.func @transform_2(%arg0: i32, %arg1: i32) -> (i32, i32) {
    %c0_i32 = arith.constant 0 : i32
    %c0_i32_0 = arith.constant 0 : i32
    return %c0_i32, %arg1 : i32, i32
  }
  func.func @transform_3(%arg0: i32, %arg1: i32) -> (i32, i32) {
    %c0_i32 = arith.constant 0 : i32
    return %arg0, %arg1 : i32, i32
  }
}

module attributes {stable_mosaic.version = 11 : i64} {
  func.func @prenorm_linear_kernel(%arg0: i32, %arg1: i32, %arg2: memref<16x32xf32, #tpu.memory_space<vmem>>, %arg3: memref<32x32xbf16, #tpu.memory_space<vmem>>, %arg4: memref<1x32xf32, #tpu.memory_space<vmem>>, %arg5: memref<16x32xf32, #tpu.memory_space<vmem>>, %arg6: memref<16x32xbf16, #tpu.memory_space<vmem>>) attributes {dimension_semantics = [#tpu.dimension_semantics<parallel>, #tpu.dimension_semantics<arbitrary>], iteration_bounds = array<i64: 1, 1>, scalar_prefetch = 0 : i64, scratch_operands = 1 : i64, tpu.core_type = #tpu.core_type<tc>, window_params = [{transform_indices = @transform_0, window_bounds = array<i64: 16, 32>}, {transform_indices = @transform_1, window_bounds = array<i64: 32, 32>}, {transform_indices = @transform_2, window_bounds = array<i64: 1, 32>}, {transform_indices = @transform_3, window_bounds = array<i64: 16, 32>}]} {
    %c0_i32 = arith.constant 0 : i32
    %0 = arith.cmpi eq, %arg1, %c0_i32 : i32
    %1 = arith.extui %0 : i1 to i32
    %c0_i32_0 = arith.constant 0 : i32
    %2 = arith.cmpi ne, %1, %c0_i32_0 : i32
    scf.if %2 {
      %c0_8 = arith.constant 0 : index
      %c0_9 = arith.constant 0 : index
      %10 = vector.load %arg2[%c0_8, %c0_9] : memref<16x32xf32, #tpu.memory_space<vmem>>, vector<16x32xf32>
      %cst_10 = arith.constant dense<0.000000e+00> : vector<16xf32>
      %11 = vector.multi_reduction <add>, %10, %cst_10 [1] : vector<16x32xf32> to vector<16xf32>
      %12 = vector.shape_cast %11 : vector<16xf32> to vector<16x1xf32>
      %13 = arith.mulf %10, %10 : vector<16x32xf32>
      %cst_11 = arith.constant dense<0.000000e+00> : vector<16xf32>
      %14 = vector.multi_reduction <add>, %13, %cst_11 [1] : vector<16x32xf32> to vector<16xf32>
      %15 = vector.shape_cast %14 : vector<16xf32> to vector<16x1xf32>
      %cst_12 = arith.constant 3.125000e-02 : f32
      %16 = vector.broadcast %cst_12 : f32 to vector<16x1xf32>
      %17 = arith.mulf %12, %16 : vector<16x1xf32>
      %cst_13 = arith.constant 3.125000e-02 : f32
      %18 = vector.broadcast %cst_13 : f32 to vector<16x1xf32>
      %19 = arith.mulf %15, %18 : vector<16x1xf32>
      %20 = arith.mulf %17, %17 : vector<16x1xf32>
      %21 = arith.subf %19, %20 : vector<16x1xf32>
      %cst_14 = arith.constant 0.000000e+00 : f32
      %22 = vector.broadcast %cst_14 : f32 to vector<16x1xf32>
      %23 = arith.maximumf %21, %22 : vector<16x1xf32>
      %cst_15 = arith.constant 9.99999974E-6 : f32
      %24 = vector.broadcast %cst_15 : f32 to vector<16x1xf32>
      %25 = arith.addf %23, %24 : vector<16x1xf32>
      %26 = math.rsqrt %25 : vector<16x1xf32>
      %27 = vector.broadcast %17 : vector<16x1xf32> to vector<16x32xf32>
      %28 = arith.subf %10, %27 : vector<16x32xf32>
      %29 = vector.broadcast %26 : vector<16x1xf32> to vector<16x32xf32>
      %30 = arith.mulf %28, %29 : vector<16x32xf32>
      %31 = arith.truncf %30 : vector<16x32xf32> to vector<16x32xbf16>
      %c0_16 = arith.constant 0 : index
      %c0_17 = arith.constant 0 : index
      %32 = vector.load %arg6[%c0_16, %c0_17] : memref<16x32xbf16, #tpu.memory_space<vmem>>, vector<16x32xbf16>
      tpu.vector_store %arg6[%c0_16, %c0_17], %31 {strides = array<i32>} : memref<16x32xbf16, #tpu.memory_space<vmem>>, vector<16x32xbf16>,
    } else {
    }
    %c0 = arith.constant 0 : index
    %c0_1 = arith.constant 0 : index
    %3 = vector.load %arg6[%c0, %c0_1] : memref<16x32xbf16, #tpu.memory_space<vmem>>, vector<16x32xbf16>
    %c0_2 = arith.constant 0 : index
    %c0_3 = arith.constant 0 : index
    %4 = vector.load %arg3[%c0_2, %c0_3] : memref<32x32xbf16, #tpu.memory_space<vmem>>, vector<32x32xbf16>
    %cst = arith.constant dense<0.000000e+00> : vector<16x32xf32>
    %5 = tpu.matmul %3, %4, %cst {dimension_numbers = #tpu.dot_dimension_numbers<[1], [0], [0], [1], [0, 0, 1, 1], [], []>} : vector<16x32xbf16>, vector<32x32xbf16>, vector<16x32xf32> -> vector<16x32xf32>
    %c0_4 = arith.constant 0 : index
    %c0_5 = arith.constant 0 : index
    %6 = vector.load %arg4[%c0_4, %c0_5] : memref<1x32xf32, #tpu.memory_space<vmem>>, vector<1x32xf32>
    %7 = vector.broadcast %6 : vector<1x32xf32> to vector<16x32xf32>
    %8 = arith.addf %5, %7 : vector<16x32xf32>
    %c0_6 = arith.constant 0 : index
    %c0_7 = arith.constant 0 : index
    %9 = vector.load %arg5[%c0_6, %c0_7] : memref<16x32xf32, #tpu.memory_space<vmem>>, vector<16x32xf32>
    tpu.vector_store %arg5[%c0_6, %c0_7], %8 {strides = array<i32>} : memref<16x32xf32, #tpu.memory_space<vmem>>, vector<16x32xf32>,
    return
  }
  func.func @transform_0(%arg0: i32, %arg1: i32) -> (i32, i32) {
    %c0_i32 = arith.constant 0 : i32
    %c0_i32_0 = arith.constant 0 : i32
    return %arg0, %c0_i32 : i32, i32
  }
  func.func @transform_1(%arg0: i32, %arg1: i32) -> (i32, i32) {
    %c0_i32 = arith.constant 0 : i32
    %c0_i32_0 = arith.constant 0 : i32
    return %c0_i32, %arg1 : i32, i32
  }
  func.func @transform_2(%arg0: i32, %arg1: i32) -> (i32, i32) {
    %c0_i32 = arith.constant 0 : i32
    %c0_i32_0 = arith.constant 0 : i32
    return %c0_i32, %arg1 : i32, i32
  }
  func.func @transform_3(%arg0: i32, %arg1: i32) -> (i32, i32) {
    %c0_i32 = arith.constant 0 : i32
    return %arg0, %arg1 : i32, i32
  }
}

</mosaic_0001>

<bundles_post_ra>
// kernel: tpu_custom_call.1
= control target key start
LH: loop header
LB: loop body
LE: loop exit
PB: predicated region body
PF: predicated region fallthrough
CT: control target
= control target key end

     0   :  { %8 = vsyncpa [#allocation4], 0  ;;  %s345_s0 = inlined_call_operand.hbm [shape: f32[16,32], index: 0, kind: input, shape index: {}]   ;;  %s346_s1 = inlined_call_operand.hbm [shape: bf16[32,32], index: 1, kind: input, shape index: {}]   ;;  %s347_s2 = inlined_call_operand.vmem [shape: f32[1,32], index: 2, kind: input, shape index: {}]   ;;  %s348_s3 = inlined_call_operand.hbm [shape: f32[16,32], index: 3, kind: output, shape index: {}]  }
   0x1   :  { %9 = vsyncpa [#allocation7], 0 }
   0x2   :  { %10 = vsyncpa [#allocation5], 0  ;;  %s291_s12 = smov [#allocation3]  }
   0x3   :  { %s16_s13 = sshll.u32 %s291_s12, 4  ;;  %s17_s13 = int_to_ptr.vmem [resolvable:$true] %s16_s13 }
   0x4   :  { %s233_s14 = scalar_lea.vmem %s17_s13, 256  ;;  %p238_p1 = scmp.lt.s32.totalorder %s17_s13, %s17_s13 }
   0x5   :  { %p234_p0 = scmp.ne.s32.totalorder %s17_s13, %s233_s14  ;;  %p239_p2 = scmp.lt.s32.totalorder %s233_s14, %s233_s14 }
   0x7   :  { %p240_p3 = por %p239_p2, %p238_p1 }
   0x9   :  { %p241_p4 = pnand %p240_p3, %p234_p0 }
   0xb   :  { %244 = shalt.err (!%p241_p4)
}
   0xc   :  { %s292_s15 = smov 128   ;;  %s293_s16 = smov 8  }
   0xd   :  { %22 = dma.hbm_to_vmem [thread:$0]  %s345_s0, 256, %s17_s13, [#allocation4], %s292_s15, %s292_s15, %s293_s16  }
   0xe   :  { %s294_s19 = smov [#allocation6]  }
   0xf   :  { %s28_s20 = sshll.u32 %s294_s19, 4  ;;  %s29_s20 = int_to_ptr.vmem [resolvable:$true] %s28_s20 }
  0x10   :  { %s253_s21 = scalar_lea.vmem %s29_s20, 256  ;;  %p258_p6 = scmp.lt.s32.totalorder %s29_s20, %s29_s20 }
  0x11   :  { %p254_p5 = scmp.ne.s32.totalorder %s29_s20, %s253_s21  ;;  %p259_p7 = scmp.lt.s32.totalorder %s253_s21, %s253_s21 }
  0x13   :  { %p260_p8 = por %p259_p7, %p258_p6 }
  0x15   :  { %p261_p9 = pnand %p260_p8, %p254_p5 }
  0x17   :  { %264 = shalt.err (!%p261_p9)
}
  0x18   :  { %s295_s22 = smov 64   ;;  %s296_s23 = smov 4  }
  0x19   :  { %34 = dma.hbm_to_vmem [thread:$0]  %s346_s1, 256, %s29_s20, [#allocation7], %s295_s22, %s295_s22, %s296_s23  }
  0x1a   :  { %285 = dma.done.wait [#allocation4], 256  }
  0x1b   :  { %286 = vsyncadd [#allocation4], 4294967040 }
  0x1c   :  { %287 = dma.done.wait [#allocation7], 256  }
  0x1d   :  { %288 = vsyncadd [#allocation7], 4294967040  ;;  %vm50_vm0 = vcmask 261120   ;;  %v48_v0 = vld [vmem:[#allocation3] sm:$0xff]  ;;  %v49_v1 = vld [vmem:[#allocation3 + $0x8] sm:$0xff]  ;;  %v297_v9 = vmov 0.0  }
  0x1e   :  { %v51_v2 = vsel %vm50_vm0, %v48_v0, 0.0  ;;  %v57_v3 = vmul.f32 %v48_v0, %v48_v0  ;;  %v58_v4 = vmul.f32 %v49_v1, %v49_v1  ;;  %v54_v6 = vsel %vm50_vm0, %v49_v1, 0.0  ;;  %v218_v8 = vld [vmem:[#allocation6 + $0x8] sm:$0xff]   ;;  %201 = vmatprep.subr.bf16.mxu0 %v297_v9  ;;  %v219_v10 = vld [vmem:[#allocation6] sm:$0xff]   ;;  %s299_s26 = smov [#allocation8]  }
  0x1f   :  { %52 = vadd.xlane.f32.xlu0 %v51_v2  ;;  %vm298_vm1 = vmmov 0   ;;  %202 = vmatpush3.bf16.msra.mxu0 %v218_v8  ;;  %vm91_vm2 = vcmask 257024   ;;  %v191_v36 = vld [vmem:[%s347_s2] ss:$0 sm:$0xff]  ;;  %s176_s27 = sshll.u32 %s299_s26, 4  ;;  %s177_s27 = int_to_ptr.vmem [resolvable:$true] %s176_s27 }
  0x20   :  { %v59_v5 = vsel %vm50_vm0, %v57_v3, 0.0  ;;  %v62_v7 = vsel %vm50_vm0, %v58_v4, 0.0  ;;  %205 = vmatprep.mubr.msk.bf16.mxu0 %vm298_vm1, %v297_v9  ;;  %203 = vmatprep.subr.bf16.mxu0 %v297_v9  ;;  %s265_s28 = scalar_lea.vmem %s177_s27, 256  ;;  %p270_p11 = scmp.lt.s32.totalorder %s177_s27, %s177_s27 }
  0x21   :  { %60 = vadd.xlane.f32.xlu1 %v59_v5  ;;  %p266_p10 = scmp.ne.s32.totalorder %s177_s27, %s265_s28  ;;  %p271_p12 = scmp.lt.s32.totalorder %s265_s28, %s265_s28 }
  0x23   :  { %55 = vadd.xlane.f32.xlu0 %v54_v6  ;;  %204 = vmatpush3.bf16.msra.mxu0 %v219_v10  ;;  %p272_p13 = por %p271_p12, %p270_p11 }
  0x25   :  { %63 = vadd.xlane.f32.xlu1 %v62_v7  ;;  %p273_p0 = pnand %p272_p13, %p266_p10 }
  0xa8   :  { %v53_v11 = vpop.xlane.xlu0 %52 }
  0xa9   :  { %v65_v12 = vmul.f32 0.03125, %v53_v11 }
  0xaa   :  { %v61_v13 = vpop.xlane.xlu1 %60 }
  0xab   :  { %v69_v14 = vmul.f32 %v65_v12, %v65_v12  ;;  %v67_v15 = vmul.f32 0.03125, %v61_v13  ;;  %v79_v27 = vsub.f32 %v48_v0, %v65_v12 }
  0xac   :  { %v56_v16 = vpop.xlane.xlu0 %55 }
  0xad   :  { %v71_v17 = vsub.f32 %v67_v15, %v69_v14  ;;  %v66_v18 = vmul.f32 0.03125, %v56_v16 }
  0xae   :  { %v64_v19 = vpop.xlane.xlu1 %63 }
  0xaf   :  { %v73_v20 = vmax.f32 %v71_v17, 0.0  ;;  %v70_v21 = vmul.f32 %v66_v18, %v66_v18  ;;  %v68_v22 = vmul.f32 0.03125, %v64_v19  ;;  %v80_v31 = vsub.f32 %v49_v1, %v66_v18 }
  0xb1   :  { %v75_v23 = vadd.f32 1e-05, %v73_v20  ;;  %v72_v24 = vsub.f32 %v68_v22, %v70_v21 }
  0xb3   :  { %221 = vrsqrt.f32 %v75_v23  ;;  %v74_v25 = vmax.f32 %v72_v24, 0.0 }
  0xb5   :  { %v76_v26 = vadd.f32 1e-05, %v74_v25 }
  0xb7   :  { %223 = vrsqrt.f32 %v76_v26 }
  0xc0   :  { %v222_v28 = vpop.eup %221 }
  0xc1   :  { %v81_v29 = vmul.f32 %v222_v28, %v79_v27 }
  0xc3   :  { %v196_v30 = vpack.c.bf16 %v81_v29, %v81_v29 }
  0xc4   :  { %v224_v32 = vpop.eup %223 }
  0xc5   :  { %92 = vst.msk [vmem:[#allocation2] sm:$0xf] %vm91_vm2, %v196_v30  ;;  %v82_v33 = vmul.f32 %v224_v32, %v80_v31 }
  0xc7   :  { %v197_v34 = vpack.c.bf16 %v82_v33, %v82_v33 }
  0xc9   :  { %93 = vst.msk [vmem:[#allocation2 + $0x4] sm:$0xf] %vm91_vm2, %v197_v34 }
  0xd0   :  { %v220_v35 = vld [vmem:[#allocation2] sm:$0xff]  }
  0xd1   :  { %206 = vmatmul.mubr.msk.bf16.vlgmr.msra.gmra.mxu0 %vm50_vm0, %v220_v35 }
 0x191   :  { %v162_v37 = vpop.f32.mrf.mxu0 }
 0x192   :  { %v163_v38 = vadd.f32 %v191_v36, %v162_v37 }
 0x193   :  { %v207_v39 = vpop.f32.mrf.mxu0 }
 0x194   :  { %169 = vst.msk [vmem:[#allocation8] sm:$0xff] %vm50_vm0, %v163_v38 }
 0x195   :  { %v165_v40 = vpop.f32.mrf.mxu0 }
 0x196   :  { %v166_v41 = vadd.f32 %v191_v36, %v165_v40 }
 0x197   :  { %v208_v42 = vpop.f32.mrf.mxu0 }
 0x198   :  { %170 = vst.msk [vmem:[#allocation8 + $0x8] sm:$0xff] %vm50_vm0, %v166_v41 }
 0x199   :  { %276 = shalt.err (!%p273_p0)
}
 0x19a   :  { %182 = dma.vmem_to_hbm [thread:$0]  %s177_s27, 256, %s348_s3, [#allocation5], %s292_s15, %s292_s15, %s293_s16  }
 0x19b   :  { %289 = dma.done.wait [#allocation5], 256  }
 0x19c   :  { %290 = vsyncadd [#allocation5], 4294967040 }
 0x19d   :  { %186 = vsyncpa [#allocation4], 1 }
 0x19e   :  { %187 = vsyncpa [#allocation7], 1 }
 0x19f   :  { %188 = vsyncpa [#allocation5], 1 }

// kernel: tpu_custom_call.1
= control target key start
LH: loop header
LB: loop body
LE: loop exit
PB: predicated region body
PF: predicated region fallthrough
CT: control target
= control target key end

     0   :  { %8 = vsyncpa [#allocation4], 0  ;;  %s345_s0 = inlined_call_operand.hbm [shape: f32[16,32], index: 0, kind: input, shape index: {}]   ;;  %s346_s1 = inlined_call_operand.hbm [shape: bf16[32,32], index: 1, kind: input, shape index: {}]   ;;  %s347_s2 = inlined_call_operand.vmem [shape: f32[1,32], index: 2, kind: input, shape index: {}]   ;;  %s348_s3 = inlined_call_operand.hbm [shape: f32[16,32], index: 3, kind: output, shape index: {}]  }
   0x1   :  { %9 = vsyncpa [#allocation7], 0 }
   0x2   :  { %10 = vsyncpa [#allocation5], 0  ;;  %s291_s12 = smov [#allocation3]  }
   0x3   :  { %s16_s13 = sshll.u32 %s291_s12, 4  ;;  %s17_s13 = int_to_ptr.vmem [resolvable:$true] %s16_s13 }
   0x4   :  { %s233_s14 = scalar_lea.vmem %s17_s13, 256  ;;  %p238_p1 = scmp.lt.s32.totalorder %s17_s13, %s17_s13 }
   0x5   :  { %p234_p0 = scmp.ne.s32.totalorder %s17_s13, %s233_s14  ;;  %p239_p2 = scmp.lt.s32.totalorder %s233_s14, %s233_s14 }
   0x7   :  { %p240_p3 = por %p239_p2, %p238_p1 }
   0x9   :  { %p241_p4 = pnand %p240_p3, %p234_p0 }
   0xb   :  { %244 = shalt.err (!%p241_p4)
}
   0xc   :  { %s292_s15 = smov 128   ;;  %s293_s16 = smov 8  }
   0xd   :  { %22 = dma.hbm_to_vmem [thread:$0]  %s345_s0, 256, %s17_s13, [#allocation4], %s292_s15, %s292_s15, %s293_s16  }
   0xe   :  { %s294_s19 = smov [#allocation6]  }
   0xf   :  { %s28_s20 = sshll.u32 %s294_s19, 4  ;;  %s29_s20 = int_to_ptr.vmem [resolvable:$true] %s28_s20 }
  0x10   :  { %s253_s21 = scalar_lea.vmem %s29_s20, 256  ;;  %p258_p6 = scmp.lt.s32.totalorder %s29_s20, %s29_s20 }
  0x11   :  { %p254_p5 = scmp.ne.s32.totalorder %s29_s20, %s253_s21  ;;  %p259_p7 = scmp.lt.s32.totalorder %s253_s21, %s253_s21 }
  0x13   :  { %p260_p8 = por %p259_p7, %p258_p6 }
  0x15   :  { %p261_p9 = pnand %p260_p8, %p254_p5 }
  0x17   :  { %264 = shalt.err (!%p261_p9)
}
  0x18   :  { %s295_s22 = smov 64   ;;  %s296_s23 = smov 4  }
  0x19   :  { %34 = dma.hbm_to_vmem [thread:$0]  %s346_s1, 256, %s29_s20, [#allocation7], %s295_s22, %s295_s22, %s296_s23  }
  0x1a   :  { %285 = dma.done.wait [#allocation4], 256  }
  0x1b   :  { %286 = vsyncadd [#allocation4], 4294967040 }
  0x1c   :  { %287 = dma.done.wait [#allocation7], 256  }
  0x1d   :  { %288 = vsyncadd [#allocation7], 4294967040  ;;  %vm50_vm0 = vcmask 261120   ;;  %v48_v0 = vld [vmem:[#allocation3] sm:$0xff]  ;;  %v49_v1 = vld [vmem:[#allocation3 + $0x8] sm:$0xff]  ;;  %v297_v9 = vmov 0.0  }
  0x1e   :  { %v51_v2 = vsel %vm50_vm0, %v48_v0, 0.0  ;;  %v57_v3 = vmul.f32 %v48_v0, %v48_v0  ;;  %v58_v4 = vmul.f32 %v49_v1, %v49_v1  ;;  %v54_v6 = vsel %vm50_vm0, %v49_v1, 0.0  ;;  %v218_v8 = vld [vmem:[#allocation6 + $0x8] sm:$0xff]   ;;  %201 = vmatprep.subr.bf16.mxu0 %v297_v9  ;;  %v219_v10 = vld [vmem:[#allocation6] sm:$0xff]   ;;  %s299_s26 = smov [#allocation8]  }
  0x1f   :  { %52 = vadd.xlane.f32.xlu0 %v51_v2  ;;  %vm298_vm1 = vmmov 0   ;;  %202 = vmatpush3.bf16.msra.mxu0 %v218_v8  ;;  %vm91_vm2 = vcmask 257024   ;;  %v191_v36 = vld [vmem:[%s347_s2] ss:$0 sm:$0xff]  ;;  %s176_s27 = sshll.u32 %s299_s26, 4  ;;  %s177_s27 = int_to_ptr.vmem [resolvable:$true] %s176_s27 }
  0x20   :  { %v59_v5 = vsel %vm50_vm0, %v57_v3, 0.0  ;;  %v62_v7 = vsel %vm50_vm0, %v58_v4, 0.0  ;;  %205 = vmatprep.mubr.msk.bf16.mxu0 %vm298_vm1, %v297_v9  ;;  %203 = vmatprep.subr.bf16.mxu0 %v297_v9  ;;  %s265_s28 = scalar_lea.vmem %s177_s27, 256  ;;  %p270_p11 = scmp.lt.s32.totalorder %s177_s27, %s177_s27 }
  0x21   :  { %60 = vadd.xlane.f32.xlu1 %v59_v5  ;;  %p266_p10 = scmp.ne.s32.totalorder %s177_s27, %s265_s28  ;;  %p271_p12 = scmp.lt.s32.totalorder %s265_s28, %s265_s28 }
  0x23   :  { %55 = vadd.xlane.f32.xlu0 %v54_v6  ;;  %204 = vmatpush3.bf16.msra.mxu0 %v219_v10  ;;  %p272_p13 = por %p271_p12, %p270_p11 }
  0x25   :  { %63 = vadd.xlane.f32.xlu1 %v62_v7  ;;  %p273_p0 = pnand %p272_p13, %p266_p10 }
  0xa8   :  { %v53_v11 = vpop.xlane.xlu0 %52 }
  0xa9   :  { %v65_v12 = vmul.f32 0.03125, %v53_v11 }
  0xaa   :  { %v61_v13 = vpop.xlane.xlu1 %60 }
  0xab   :  { %v69_v14 = vmul.f32 %v65_v12, %v65_v12  ;;  %v67_v15 = vmul.f32 0.03125, %v61_v13  ;;  %v79_v27 = vsub.f32 %v48_v0, %v65_v12 }
  0xac   :  { %v56_v16 = vpop.xlane.xlu0 %55 }
  0xad   :  { %v71_v17 = vsub.f32 %v67_v15, %v69_v14  ;;  %v66_v18 = vmul.f32 0.03125, %v56_v16 }
  0xae   :  { %v64_v19 = vpop.xlane.xlu1 %63 }
  0xaf   :  { %v73_v20 = vmax.f32 %v71_v17, 0.0  ;;  %v70_v21 = vmul.f32 %v66_v18, %v66_v18  ;;  %v68_v22 = vmul.f32 0.03125, %v64_v19  ;;  %v80_v31 = vsub.f32 %v49_v1, %v66_v18 }
  0xb1   :  { %v75_v23 = vadd.f32 1e-05, %v73_v20  ;;  %v72_v24 = vsub.f32 %v68_v22, %v70_v21 }
  0xb3   :  { %221 = vrsqrt.f32 %v75_v23  ;;  %v74_v25 = vmax.f32 %v72_v24, 0.0 }
  0xb5   :  { %v76_v26 = vadd.f32 1e-05, %v74_v25 }
  0xb7   :  { %223 = vrsqrt.f32 %v76_v26 }
  0xc0   :  { %v222_v28 = vpop.eup %221 }
  0xc1   :  { %v81_v29 = vmul.f32 %v222_v28, %v79_v27 }
  0xc3   :  { %v196_v30 = vpack.c.bf16 %v81_v29, %v81_v29 }
  0xc4   :  { %v224_v32 = vpop.eup %223 }
  0xc5   :  { %92 = vst.msk [vmem:[#allocation2] sm:$0xf] %vm91_vm2, %v196_v30  ;;  %v82_v33 = vmul.f32 %v224_v32, %v80_v31 }
  0xc7   :  { %v197_v34 = vpack.c.bf16 %v82_v33, %v82_v33 }
  0xc9   :  { %93 = vst.msk [vmem:[#allocation2 + $0x4] sm:$0xf] %vm91_vm2, %v197_v34 }
  0xd0   :  { %v220_v35 = vld [vmem:[#allocation2] sm:$0xff]  }
  0xd1   :  { %206 = vmatmul.mubr.msk.bf16.vlgmr.msra.gmra.mxu0 %vm50_vm0, %v220_v35 }
 0x191   :  { %v162_v37 = vpop.f32.mrf.mxu0 }
 0x192   :  { %v163_v38 = vadd.f32 %v191_v36, %v162_v37 }
 0x193   :  { %v207_v39 = vpop.f32.mrf.mxu0 }
 0x194   :  { %169 = vst.msk [vmem:[#allocation8] sm:$0xff] %vm50_vm0, %v163_v38 }
 0x195   :  { %v165_v40 = vpop.f32.mrf.mxu0 }
 0x196   :  { %v166_v41 = vadd.f32 %v191_v36, %v165_v40 }
 0x197   :  { %v208_v42 = vpop.f32.mrf.mxu0 }
 0x198   :  { %170 = vst.msk [vmem:[#allocation8 + $0x8] sm:$0xff] %vm50_vm0, %v166_v41 }
 0x199   :  { %276 = shalt.err (!%p273_p0)
}
 0x19a   :  { %182 = dma.vmem_to_hbm [thread:$0]  %s177_s27, 256, %s348_s3, [#allocation5], %s292_s15, %s292_s15, %s293_s16  }
 0x19b   :  { %289 = dma.done.wait [#allocation5], 256  }
 0x19c   :  { %290 = vsyncadd [#allocation5], 4294967040 }
 0x19d   :  { %186 = vsyncpa [#allocation4], 1 }
 0x19e   :  { %187 = vsyncpa [#allocation7], 1 }
 0x19f   :  { %188 = vsyncpa [#allocation5], 1 }

</bundles_post_ra>
